<compile_context>
chip_gen: v6e
topology: v6e:2x2x1
jax: 0.10.0
libtpu: 0.0.40
codegen_flags: <defaults>
</compile_context>

<pallas_src>
import jax
import jax.numpy as jnp
from jax.experimental import pallas as pl
from jax.experimental.pallas import tpu as pltpu


def _rowsum_sqdiff_kernel(pred_ref, gt_ref, out_ref):
    # (TR, P) in native dtype -> f32 -> per-row sum of squared differences.
    d = pred_ref[...].astype(jnp.float32) - gt_ref[...].astype(jnp.float32)
    out_ref[...] = jnp.sum(d * d, axis=-1, keepdims=True)   # (TR, 1)


def joints_mse_loss(output, target, target_weight, use_target_weight=True):
    """output/target: (B, J, H, W); target_weight: (B, J, 1). Returns scalar f32."""
    B, J, H, W = output.shape
    P = H * W
    N = B * J

    # Free, contiguous views — no HBM transpose. Row index = b*J + j.
    pred = output.reshape(N, P)
    gt = target.reshape(N, P)

    # Sublane multiple for the native input dtype (f32:8, bf16:16, int8/fp8:32).
    itemsize = int(jnp.dtype(output.dtype).itemsize)
    sub_mult = {4: 8, 2: 16, 1: 32}.get(itemsize, 8)

    def ceil_to(x, m):
        return -(-x // m) * m

    # Rows per tile: dtype-aware joint budget over the live double-buffered
    # VMEM: 2 buffers x (pred row + gt row in native bytes + lane-padded
    # (TR, 1) f32 output row). ~36 MiB live => ~9 MiB per input per step.
    vmem_budget = 36 * 1024 * 1024
    bytes_per_row_live = 2 * (2 * P * itemsize + 128 * 4)
    row_budget = max(1, vmem_budget // bytes_per_row_live)
    tr = max(sub_mult, (row_budget // sub_mult) * sub_mult)
    # Cap so the parallel grid axis has >= 2 balanced steps when N allows it
    # (lets v7x's 2 TensorCores both work); no measurable cost on v5e/v6e.
    half_ceil = ceil_to((N + 1) // 2, sub_mult)
    tr = min(tr, half_ceil)
    num_tiles = -(-N // tr)

    row_sums = pl.pallas_call(
        _rowsum_sqdiff_kernel,
        out_shape=jax.ShapeDtypeStruct((N, 1), jnp.float32),
        grid_spec=pltpu.PrefetchScalarGridSpec(
            num_scalar_prefetch=0,
            grid=(num_tiles,),
            in_specs=[
                pl.BlockSpec((tr, P), lambda i: (i, 0)),   # pred rows
                pl.BlockSpec((tr, P), lambda i: (i, 0)),   # gt rows
            ],
            out_specs=pl.BlockSpec((tr, 1), lambda i: (i, 0)),
        ),
        compiler_params=pltpu.CompilerParams(
            dimension_semantics=("parallel",),
            vmem_limit_bytes=48 * 1024 * 1024,
        ),
    )(pred, gt)

    # Tiny O(N) epilogue in plain JAX: per-row weight^2 + single normalization.
    row_sums = row_sums[:, 0]                               # (N,), f32
    if use_target_weight:
        w2 = target_weight.reshape(N).astype(jnp.float32) ** 2
        total = jnp.sum(row_sums * w2)
    else:
        total = jnp.sum(row_sums)
    return total * (0.5 / float(J * B * P))


def _reference(output, target, target_weight, use_target_weight=True):
    B, J, H, W = output.shape
    pred = output.reshape(B, J, -1).astype(jnp.float32)
    gt = target.reshape(B, J, -1).astype(jnp.float32)
    loss = 0.0
    for idx in range(J):
        hp = pred[:, idx, :]
        hg = gt[:, idx, :]
        if use_target_weight:
            w = target_weight[:, idx].astype(jnp.float32)   # (B, 1)
            hp = hp * w
            hg = hg * w
        loss = loss + 0.5 * jnp.mean((hp - hg) ** 2)
    return loss / J


if __name__ == "__main__":
    key = jax.random.PRNGKey(0)
    k1, k2, k3 = jax.random.split(key, 3)

    B, J, H, W = 2, 4, 16, 16
    output = jax.random.normal(k1, (B, J, H, W), dtype=jnp.float32)
    target = jax.random.normal(k2, (B, J, H, W), dtype=jnp.float32)
    target_weight = jax.random.uniform(k3, (B, J, 1), dtype=jnp.float32)

    # Weighted path.
    loss_w = joints_mse_loss(output, target, target_weight, use_target_weight=True)
    loss_w = jax.block_until_ready(loss_w)
    ref_w = _reference(output, target, target_weight, use_target_weight=True)
    assert jnp.allclose(loss_w, ref_w, rtol=1e-5, atol=1e-5), (loss_w, ref_w)

    # Unweighted path (target_weight never enters the kernel here).
    loss_u = joints_mse_loss(output, target, target_weight, use_target_weight=False)
    loss_u = jax.block_until_ready(loss_u)
    ref_u = _reference(output, target, target_weight, use_target_weight=False)
    assert jnp.allclose(loss_u, ref_u, rtol=1e-5, atol=1e-5), (loss_u, ref_u)

    print("KERNEL_OK")
</pallas_src>

<mosaic_0001>
module attributes {stable_mosaic.version = 11 : i64} {
  func.func @_rowsum_sqdiff_kernel(%arg0: i32, %arg1: memref<8x256xf32, #tpu.memory_space<vmem>>, %arg2: memref<8x256xf32, #tpu.memory_space<vmem>>, %arg3: memref<8x1xf32, #tpu.memory_space<vmem>>) attributes {dimension_semantics = [#tpu.dimension_semantics<parallel>], iteration_bounds = array<i64: 1>, scalar_prefetch = 0 : i64, scratch_operands = 0 : i64, tpu.core_type = #tpu.core_type<tc>, window_params = [{transform_indices = @transform_0, window_bounds = array<i64: 8, 256>}, {transform_indices = @transform_1, window_bounds = array<i64: 8, 256>}, {transform_indices = @transform_2, window_bounds = array<i64: 8, 1>}]} {
    %c0 = arith.constant 0 : index
    %c0_0 = arith.constant 0 : index
    %0 = vector.load %arg1[%c0, %c0_0] : memref<8x256xf32, #tpu.memory_space<vmem>>, vector<8x256xf32>
    %c0_1 = arith.constant 0 : index
    %c0_2 = arith.constant 0 : index
    %1 = vector.load %arg2[%c0_1, %c0_2] : memref<8x256xf32, #tpu.memory_space<vmem>>, vector<8x256xf32>
    %2 = arith.subf %0, %1 : vector<8x256xf32>
    %3 = arith.mulf %2, %2 : vector<8x256xf32>
    %cst = arith.constant dense<0.000000e+00> : vector<8xf32>
    %4 = vector.multi_reduction <add>, %3, %cst [1] : vector<8x256xf32> to vector<8xf32>
    %5 = vector.shape_cast %4 : vector<8xf32> to vector<8x1xf32>
    %c0_3 = arith.constant 0 : index
    %c0_4 = arith.constant 0 : index
    %6 = vector.load %arg3[%c0_3, %c0_4] : memref<8x1xf32, #tpu.memory_space<vmem>>, vector<8x1xf32>
    tpu.vector_store %arg3[%c0_3, %c0_4], %5 {strides = array<i32>} : memref<8x1xf32, #tpu.memory_space<vmem>>, vector<8x1xf32>,
    return
  }
  func.func @transform_0(%arg0: i32) -> (i32, i32) {
    %c0_i32 = arith.constant 0 : i32
    %c0_i32_0 = arith.constant 0 : i32
    return %arg0, %c0_i32 : i32, i32
  }
  func.func @transform_1(%arg0: i32) -> (i32, i32) {
    %c0_i32 = arith.constant 0 : i32
    %c0_i32_0 = arith.constant 0 : i32
    return %arg0, %c0_i32 : i32, i32
  }
  func.func @transform_2(%arg0: i32) -> (i32, i32) {
    %c0_i32 = arith.constant 0 : i32
    %c0_i32_0 = arith.constant 0 : i32
    return %arg0, %c0_i32 : i32, i32
  }
}

</mosaic_0001>

<bundles_post_ra>
// kernel: tpu_custom_call.1
= control target key start
LH: loop header
LB: loop body
LE: loop exit
PB: predicated region body
PF: predicated region fallthrough
CT: control target
= control target key end

     0   :  { %7 = vsyncpa [#allocation3], 0  ;;  %s126_s0 = inlined_call_operand.hbm [shape: f32[8,256], index: 0, kind: input, shape index: {}]   ;;  %s127_s1 = inlined_call_operand.hbm [shape: f32[8,256], index: 1, kind: input, shape index: {}]   ;;  %s128_s2 = inlined_call_operand.vmem [shape: f32[8,1], index: 2, kind: output, shape index: {}]  }
   0x1   :  { %8 = vsyncpa [#allocation5], 0  ;;  %s100_s9 = smov [#allocation2]   ;;  %s101_s11 = smov [#allocation4]  }
   0x2   :  { %s15_s10 = sshll.u32 %s100_s9, 4  ;;  %s25_s12 = sshll.u32 %s101_s11, 4  ;;  %s16_s10 = int_to_ptr.vmem [resolvable:$true] %s15_s10  ;;  %s26_s12 = int_to_ptr.vmem [resolvable:$true] %s25_s12 }
   0x3   :  { %s64_s13 = scalar_lea.vmem %s16_s10, 256  ;;  %p69_p1 = scmp.lt.s32.totalorder %s16_s10, %s16_s10 }
   0x4   :  { %p65_p0 = scmp.ne.s32.totalorder %s16_s10, %s64_s13  ;;  %p70_p2 = scmp.lt.s32.totalorder %s64_s13, %s64_s13 }
   0x6   :  { %p71_p3 = por %p70_p2, %p69_p1 }
   0x8   :  { %p72_p4 = pnand %p71_p3, %p65_p0 }
   0xa   :  { %75 = shalt.err (!%p72_p4)
}
   0xb   :  { %18 = dma.hbm_to_vmem [thread:$0]  %s126_s0, 256, %s16_s10, [#allocation3]  }
   0xc   :  { %s84_s16 = scalar_lea.vmem %s26_s12, 256  ;;  %p89_p6 = scmp.lt.s32.totalorder %s26_s12, %s26_s12 }
   0xd   :  { %p85_p5 = scmp.ne.s32.totalorder %s26_s12, %s84_s16  ;;  %p90_p7 = scmp.lt.s32.totalorder %s84_s16, %s84_s16 }
   0xf   :  { %p91_p8 = por %p90_p7, %p89_p6 }
  0x11   :  { %p92_p9 = pnand %p91_p8, %p85_p5 }
  0x13   :  { %95 = shalt.err (!%p92_p9)
}
  0x14   :  { %28 = dma.hbm_to_vmem [thread:$0]  %s127_s1, 256, %s26_s12, [#allocation5]  }
  0x15   :  { %96 = dma.done.wait [#allocation3], 256  }
  0x16   :  { %97 = vsyncadd [#allocation3], 4294967040 }
  0x17   :  { %98 = dma.done.wait [#allocation5], 256  }
  0x18   :  { %99 = vsyncadd [#allocation5], 4294967040  ;;  %v35_v0 = vld [vmem:[#allocation2] sm:$0xff]  ;;  %v36_v1 = vld [vmem:[#allocation2 + $0x8] sm:$0xff]  ;;  %vm46_vm0 = vcmask 7168  }
  0x19   :  { %v37_v2 = vld [vmem:[#allocation4] sm:$0xff]  ;;  %v38_v3 = vld [vmem:[#allocation4 + $0x8] sm:$0xff] }
  0x1a   :  { %v39_v4 = vsub.f32 %v35_v0, %v37_v2  ;;  %v40_v5 = vsub.f32 %v36_v1, %v38_v3 }
  0x1c   :  { %v41_v6 = vmul.f32 %v39_v4, %v39_v4  ;;  %v42_v7 = vmul.f32 %v40_v5, %v40_v5 }
  0x1e   :  { %v43_v8 = vadd.f32 %v42_v7, %v41_v6 }
  0x20   :  { %44 = vadd.xlane.f32.xlu0 %v43_v8 }
  0xa9   :  { %v45_v9 = vpop.xlane.xlu0 %44 }
  0xaa   :  { %47 = vst.msk [vmem:[%s128_s2] sm:$0xff] %vm46_vm0, %v45_v9 }
  0xab   :  { %52 = vsyncpa [#allocation3], 1 }
  0xac   :  { %53 = vsyncpa [#allocation5], 1 }

</bundles_post_ra>
